<compile_context>
chip_gen: v7x
topology: tpu7x:2x2x1
jax: 0.10.0
libtpu: 0.0.40
codegen_flags: <defaults>
</compile_context>

<pallas_src>
import functools

import jax
import jax.numpy as jnp
import numpy as np
from jax.experimental import pallas as pl
from jax.experimental.pallas import tpu as pltpu

F32 = jnp.float32
BF16 = jnp.bfloat16

# <= v7x guidance (64 MiB physical); generous on v5e/v6e (128 MiB).
VMEM_LIMIT = 40 * 1024 * 1024

# dot_general dims for q @ k^T without materializing a transpose
_NT_DIMS = (((1,), (1,)), ((), ()))


# ---------------------------------------------------------------------------
# math helpers (shared by the kernels and the pure-JAX reference)
# ---------------------------------------------------------------------------
def _layernorm(x, gamma, beta, eps=1e-5):
    mu = jnp.mean(x, axis=-1, keepdims=True)
    var = jnp.mean((x - mu) ** 2, axis=-1, keepdims=True)
    return (x - mu) * jax.lax.rsqrt(var + eps) * gamma + beta


def _gelu(x):
    # tanh-approximate GELU (see TODO at top); used identically in kernel and reference.
    return jax.nn.gelu(x, approximate=True)


# ---------------------------------------------------------------------------
# Stage 1: LayerNorm1 + fused qkv projection (attn scale pre-folded into q cols)
# ---------------------------------------------------------------------------
def _ln1_qkv_kernel(x_ref, g_ref, b_ref, w_ref, bias_ref, qkv_ref):
    x = x_ref[0].astype(F32)                                           # (T, C)
    xn = _layernorm(x, g_ref[...], b_ref[...]).astype(BF16)
    qkv = jnp.dot(xn, w_ref[...], preferred_element_type=F32) + bias_ref[...]
    qkv_ref[0] = qkv.astype(qkv_ref.dtype)                             # (T, 3C) lane-dense


# ---------------------------------------------------------------------------
# Stage 2: per-(batch, head, q-tile) softmax attention (q already scaled)
# ---------------------------------------------------------------------------
def _attention_kernel(q_ref, k_ref, v_ref, o_ref):
    q = q_ref[0, 0]                                                    # (TQ, hd) bf16
    k = k_ref[0, 0]                                                    # (N,  hd) bf16
    v = v_ref[0, 0]                                                    # (N,  hd) bf16
    s = jax.lax.dot_general(q, k, _NT_DIMS, preferred_element_type=F32)  # (TQ, N)
    s = s - jnp.max(s, axis=-1, keepdims=True)
    p = jnp.exp(s)
    p = p * pl.reciprocal(jnp.sum(p, axis=-1, keepdims=True), approx=True)
    o = jnp.dot(p.astype(BF16), v, preferred_element_type=F32)
    o_ref[0, 0] = o.astype(o_ref.dtype)


# ---------------------------------------------------------------------------
# Stage 3: proj + Space_Adapter + residual + LN2 + fused MLP/MLP_Adapter + residual
# ---------------------------------------------------------------------------
def _block_tail_kernel(x_ref, o_ref, wp_ref, pb_ref,
                       saw1_ref, sab1_ref, saw2_ref, sab2_ref,
                       n2g_ref, n2b_ref,
                       w1f_ref, b1f_ref, mw2_ref, mb2_ref, maw2_ref, mab2_ref,
                       out_ref, *, mlp_dim, block_scale):
    shortcut = x_ref[0].astype(F32)                                    # (T, C)

    # attention output projection: one full-depth (C) contraction
    y = jnp.dot(o_ref[0], wp_ref[...], preferred_element_type=F32) + pb_ref[...]

    # Space_Adapter (skip_connect=True): y = y + fc2(gelu(fc1(y)))
    sa = _gelu(jnp.dot(y.astype(BF16), saw1_ref[...],
                       preferred_element_type=F32) + sab1_ref[...])
    y = y + jnp.dot(sa.astype(BF16), saw2_ref[...],
                    preferred_element_type=F32) + sab2_ref[...]

    x1 = shortcut + y
    xn = _layernorm(x1, n2g_ref[...], n2b_ref[...]).astype(BF16)

    # fused fc1 = [ MLP.lin1 | MLP_Adapter.fc1 ], zero-padded to a multiple of 128 lanes
    hid = _gelu(jnp.dot(xn, w1f_ref[...], preferred_element_type=F32) + b1f_ref[...])
    m = jnp.dot(hid[:, :mlp_dim].astype(BF16), mw2_ref[...],
                preferred_element_type=F32) + mb2_ref[...]
    a = jnp.dot(hid[:, mlp_dim:].astype(BF16), maw2_ref[...],
                preferred_element_type=F32) + mab2_ref[...]

    out_ref[0] = (x1 + m + block_scale * a).astype(out_ref.dtype)


# ---------------------------------------------------------------------------
# wrapper
# ---------------------------------------------------------------------------
def hierarchical_block(x_bhwc, params, *, num_heads, block_scale,
                       seq_tile=None, q_tile=None, single_buffer_weights=True):
    B, H, W, C = x_bhwc.shape
    N = H * W
    assert C % num_heads == 0
    hd = C // num_heads
    attn_scale = hd ** (-0.5)

    if seq_tile is None:
        seq_tile = min(N, 256)
    if q_tile is None:
        q_tile = min(N, 256)
    assert N % seq_tile == 0 and (seq_tile % 8 == 0 or seq_tile == N)
    assert N % q_tile == 0 and (q_tile % 8 == 0 or q_tile == N)
    n_seq = N // seq_tile
    n_q = N // q_tile

    out_dtype = x_bhwc.dtype
    # bf16 activations end-to-end (review): halves the dominant HBM traffic.
    x_flat = x_bhwc.reshape(B, N, C).astype(BF16)

    # --- parameter prep (matmul operands bf16, biases / LN params f32) --------------
    qkv_w = params["qkv_w"].astype(F32)            # (C, 3C): [q | k | v] columns
    qkv_b = params["qkv_b"].astype(F32)            # (1, 3C)
    # fold attn_scale into the q columns (scale q, not the (TQ, N) score matrix)
    col_scale = jnp.concatenate(
        [jnp.full((C,), attn_scale, F32), jnp.ones((2 * C,), F32)])
    wqkv = (qkv_w * col_scale[None, :]).astype(BF16)
    bqkv = (qkv_b * col_scale[None, :]).astype(F32)

    n1g, n1b = params["n1_g"].astype(F32), params["n1_b"].astype(F32)
    n2g, n2b = params["n2_g"].astype(F32), params["n2_b"].astype(F32)

    wp, pb = params["proj_w"].astype(BF16), params["proj_b"].astype(F32)
    saw1, sab1 = params["sa_w1"].astype(BF16), params["sa_b1"].astype(F32)
    saw2, sab2 = params["sa_w2"].astype(BF16), params["sa_b2"].astype(F32)

    mlp_dim = int(params["mlp_w1"].shape[1])
    adapter_dim = int(params["ma_w1"].shape[1])
    fused = mlp_dim + adapter_dim
    fused_pad = ((fused + 127) // 128) * 128       # lane-align fused fc1 width (review)
    pad = fused_pad - fused
    ma_w1 = jnp.pad(params["ma_w1"], ((0, 0), (0, pad)))
    ma_b1 = jnp.pad(params["ma_b1"], ((0, 0), (0, pad)))
    maw2 = jnp.pad(params["ma_w2"], ((0, pad), (0, 0))).astype(BF16)
    mab2 = params["ma_b2"].astype(F32)
    w1f = jnp.concatenate([params["mlp_w1"], ma_w1], axis=1).astype(BF16)   # (C, fused_pad)
    b1f = jnp.concatenate([params["mlp_b1"], ma_b1], axis=1).astype(F32)
    mw2, mb2 = params["mlp_w2"].astype(BF16), params["mlp_b2"].astype(F32)

    # constant (grid-invariant) weight blocks: single-buffer them to halve their VMEM
    def _const_spec(arr):
        idx = lambda *_: (0,) * arr.ndim
        if single_buffer_weights:
            return pl.BlockSpec(arr.shape, idx, pipeline_mode=pl.Buffered(1))
        return pl.BlockSpec(arr.shape, idx)

    # ------------------------- stage 1: LN1 + qkv projection -------------------------
    qkv = pl.pallas_call(
        _ln1_qkv_kernel,
        out_shape=jax.ShapeDtypeStruct((B, N, 3 * C), BF16),
        grid=(B, n_seq),
        in_specs=[
            pl.BlockSpec((1, seq_tile, C), lambda b, i: (b, i, 0)),
            _const_spec(n1g), _const_spec(n1b),
            _const_spec(wqkv), _const_spec(bqkv),
        ],
        out_specs=pl.BlockSpec((1, seq_tile, 3 * C), lambda b, i: (b, i, 0)),
        compiler_params=pltpu.CompilerParams(
            dimension_semantics=("parallel", "parallel"),
            vmem_limit_bytes=VMEM_LIMIT),
    )(x_flat, n1g, n1b, wqkv, bqkv)

    # head-major layout plumbing done by XLA (not inside the kernel)
    qkv_h = qkv.reshape(B, N, 3, num_heads, hd).transpose(2, 0, 3, 1, 4)  # (3,B,nh,N,hd)
    q_h, k_h, v_h = qkv_h[0], qkv_h[1], qkv_h[2]

    # ------------------------- stage 2: multi-head attention -------------------------
    # q-tile axis is fastest so the (N, hd) K/V blocks stay resident per (batch, head).
    o_h = pl.pallas_call(
        _attention_kernel,
        out_shape=jax.ShapeDtypeStruct((B, num_heads, N, hd), BF16),
        grid=(B, num_heads, n_q),
        in_specs=[
            pl.BlockSpec((1, 1, q_tile, hd), lambda b, h, i: (b, h, i, 0)),
            pl.BlockSpec((1, 1, N, hd), lambda b, h, i: (b, h, 0, 0)),
            pl.BlockSpec((1, 1, N, hd), lambda b, h, i: (b, h, 0, 0)),
        ],
        out_specs=pl.BlockSpec((1, 1, q_tile, hd), lambda b, h, i: (b, h, i, 0)),
        compiler_params=pltpu.CompilerParams(
            dimension_semantics=("parallel", "parallel", "parallel"),
            vmem_limit_bytes=VMEM_LIMIT),
    )(q_h, k_h, v_h)

    o_flat = o_h.transpose(0, 2, 1, 3).reshape(B, N, C)                # back to [B, N, C]

    # ------------------------- stage 3: proj + adapters + MLP ------------------------
    out = pl.pallas_call(
        functools.partial(_block_tail_kernel,
                          mlp_dim=mlp_dim, block_scale=float(block_scale)),
        out_shape=jax.ShapeDtypeStruct((B, N, C), out_dtype),
        grid=(B, n_seq),
        in_specs=[
            pl.BlockSpec((1, seq_tile, C), lambda b, i: (b, i, 0)),    # shortcut x
            pl.BlockSpec((1, seq_tile, C), lambda b, i: (b, i, 0)),    # attention o
            _const_spec(wp), _const_spec(pb),
            _const_spec(saw1), _const_spec(sab1), _const_spec(saw2), _const_spec(sab2),
            _const_spec(n2g), _const_spec(n2b),
            _const_spec(w1f), _const_spec(b1f),
            _const_spec(mw2), _const_spec(mb2), _const_spec(maw2), _const_spec(mab2),
        ],
        out_specs=pl.BlockSpec((1, seq_tile, C), lambda b, i: (b, i, 0)),
        compiler_params=pltpu.CompilerParams(
            dimension_semantics=("parallel", "parallel"),
            vmem_limit_bytes=VMEM_LIMIT),
    )(x_flat, o_flat, wp, pb, saw1, sab1, saw2, sab2, n2g, n2b,
      w1f, b1f, mw2, mb2, maw2, mab2)

    return out.reshape(B, H, W, C)


# ---------------------------------------------------------------------------
# pure-JAX f32 reference (same math as the PyTorch module, same GELU variant)
# ---------------------------------------------------------------------------
def reference_block(x_bhwc, p, *, num_heads, block_scale):
    B, H, W, C = x_bhwc.shape
    N = H * W
    hd = C // num_heads
    attn_scale = hd ** (-0.5)
    x = x_bhwc.reshape(B, N, C).astype(jnp.float32)

    shortcut = x
    xh = _layernorm(x, p["n1_g"], p["n1_b"])
    qkv = xh @ p["qkv_w"] + p["qkv_b"]
    q, k, v = qkv[..., :C], qkv[..., C:2 * C], qkv[..., 2 * C:]

    def split_heads(t):
        return t.reshape(B, N, num_heads, hd).transpose(0, 2, 1, 3)

    qh, kh, vh = split_heads(q), split_heads(k), split_heads(v)
    attn = jnp.einsum("bhqd,bhkd->bhqk", qh * attn_scale, kh)
    attn = jax.nn.softmax(attn, axis=-1)
    o = jnp.einsum("bhqk,bhkd->bhqd", attn, vh).transpose(0, 2, 1, 3).reshape(B, N, C)
    y = o @ p["proj_w"] + p["proj_b"]
    y = y + (_gelu(y @ p["sa_w1"] + p["sa_b1"]) @ p["sa_w2"] + p["sa_b2"])
    x = shortcut + y
    xn = _layernorm(x, p["n2_g"], p["n2_b"])
    m = _gelu(xn @ p["mlp_w1"] + p["mlp_b1"]) @ p["mlp_w2"] + p["mlp_b2"]
    a = _gelu(xn @ p["ma_w1"] + p["ma_b1"]) @ p["ma_w2"] + p["ma_b2"]
    out = x + m + block_scale * a
    return out.reshape(B, H, W, C)


# ---------------------------------------------------------------------------
# deterministic parameter init + driver
# ---------------------------------------------------------------------------
def init_params(key, dim, mlp_dim, adapter_dim):
    ks = jax.random.split(key, 16)
    f32 = jnp.float32
    return {
        "n1_g": jnp.ones((1, dim), f32), "n1_b": jnp.zeros((1, dim), f32),
        "n2_g": jnp.ones((1, dim), f32), "n2_b": jnp.zeros((1, dim), f32),
        # Attention (weights stored (in, out): y = x @ W + b)
        "qkv_w": 0.05 * jax.random.normal(ks[0], (dim, 3 * dim), f32),
        "qkv_b": 0.01 * jax.random.normal(ks[1], (1, 3 * dim), f32),
        "proj_w": 0.05 * jax.random.normal(ks[2], (dim, dim), f32),
        "proj_b": 0.01 * jax.random.normal(ks[3], (1, dim), f32),
        # Space_Adapter
        "sa_w1": 0.05 * jax.random.normal(ks[4], (dim, adapter_dim), f32),
        "sa_b1": 0.01 * jax.random.normal(ks[5], (1, adapter_dim), f32),
        "sa_w2": 0.05 * jax.random.normal(ks[6], (adapter_dim, dim), f32),
        "sa_b2": 0.01 * jax.random.normal(ks[7], (1, dim), f32),
        # MLP
        "mlp_w1": 0.05 * jax.random.normal(ks[8], (dim, mlp_dim), f32),
        "mlp_b1": 0.01 * jax.random.normal(ks[9], (1, mlp_dim), f32),
        "mlp_w2": 0.05 * jax.random.normal(ks[10], (mlp_dim, dim), f32),
        "mlp_b2": 0.01 * jax.random.normal(ks[11], (1, dim), f32),
        # MLP_Adapter
        "ma_w1": 0.05 * jax.random.normal(ks[12], (dim, adapter_dim), f32),
        "ma_b1": 0.01 * jax.random.normal(ks[13], (1, adapter_dim), f32),
        "ma_w2": 0.05 * jax.random.normal(ks[14], (adapter_dim, dim), f32),
        "ma_b2": 0.01 * jax.random.normal(ks[15], (1, dim), f32),
    }


if __name__ == "__main__":
    B, H, W = 2, 8, 8
    dim = 32
    num_heads = 4
    mlp_ratio = 4.0
    block_scale = 0.5
    mlp_dim = int(dim * mlp_ratio)        # 128
    adapter_dim = int(dim * 0.25)         # 8

    key = jax.random.PRNGKey(0)
    kx, kp = jax.random.split(key)
    x = jax.random.normal(kx, (B, H, W, dim), jnp.float32)
    params = init_params(kp, dim, mlp_dim, adapter_dim)

    run = functools.partial(hierarchical_block, x, params,
                            num_heads=num_heads, block_scale=block_scale)
    try:
        out = jax.block_until_ready(run(single_buffer_weights=True))
    except Exception:
        # this JAX build rejects pipeline_mode=pl.Buffered(1); retry with default buffering
        out = jax.block_until_ready(run(single_buffer_weights=False))

    ref = jax.block_until_ready(
        reference_block(x, params, num_heads=num_heads, block_scale=block_scale))
    # kernel runs bf16 activations + bf16 MXU operands with f32 accumulation -> f32 ref
    np.testing.assert_allclose(np.asarray(out), np.asarray(ref), rtol=2e-2, atol=2e-2)

    print("KERNEL_OK")
</pallas_src>

<mosaic_0001>
module attributes {stable_mosaic.version = 11 : i64} {
  func.func @_ln1_qkv_kernel(%arg0: i32, %arg1: i32, %arg2: memref<1x64x32xbf16, #tpu.memory_space<vmem>>, %arg3: memref<1x32xf32, #tpu.memory_space<vmem>>, %arg4: memref<1x32xf32, #tpu.memory_space<vmem>>, %arg5: memref<32x96xbf16, #tpu.memory_space<vmem>>, %arg6: memref<1x96xf32, #tpu.memory_space<vmem>>, %arg7: memref<1x64x96xbf16, #tpu.memory_space<vmem>>) attributes {dimension_semantics = [#tpu.dimension_semantics<parallel>, #tpu.dimension_semantics<parallel>], iteration_bounds = array<i64: 2, 1>, scalar_prefetch = 0 : i64, scratch_operands = 0 : i64, tpu.core_type = #tpu.core_type<tc>, window_params = [{transform_indices = @transform_0, window_bounds = array<i64: 1, 64, 32>}, {pipeline_mode = #tpu.pipeline_mode<synchronous>, transform_indices = @transform_1, window_bounds = array<i64: 1, 32>}, {pipeline_mode = #tpu.pipeline_mode<synchronous>, transform_indices = @transform_2, window_bounds = array<i64: 1, 32>}, {pipeline_mode = #tpu.pipeline_mode<synchronous>, transform_indices = @transform_3, window_bounds = array<i64: 32, 96>}, {pipeline_mode = #tpu.pipeline_mode<synchronous>, transform_indices = @transform_4, window_bounds = array<i64: 1, 96>}, {transform_indices = @transform_5, window_bounds = array<i64: 1, 64, 96>}]} {
    %c0 = arith.constant 0 : index
    %c0_0 = arith.constant 0 : index
    %c0_1 = arith.constant 0 : index
    %0 = vector.load %arg2[%c0, %c0_0, %c0_1] : memref<1x64x32xbf16, #tpu.memory_space<vmem>>, vector<1x64x32xbf16>
    %1 = vector.shape_cast %0 : vector<1x64x32xbf16> to vector<64x32xbf16>
    %2 = arith.extf %1 : vector<64x32xbf16> to vector<64x32xf32>
    %c0_2 = arith.constant 0 : index
    %c0_3 = arith.constant 0 : index
    %3 = vector.load %arg3[%c0_2, %c0_3] : memref<1x32xf32, #tpu.memory_space<vmem>>, vector<1x32xf32>
    %c0_4 = arith.constant 0 : index
    %c0_5 = arith.constant 0 : index
    %4 = vector.load %arg4[%c0_4, %c0_5] : memref<1x32xf32, #tpu.memory_space<vmem>>, vector<1x32xf32>
    %cst = arith.constant dense<0.000000e+00> : vector<64xf32>
    %5 = vector.multi_reduction <add>, %2, %cst [1] : vector<64x32xf32> to vector<64xf32>
    %6 = vector.shape_cast %5 : vector<64xf32> to vector<64x1xf32>
    %cst_6 = arith.constant 3.200000e+01 : f32
    %7 = vector.broadcast %cst_6 : f32 to vector<64x1xf32>
    %8 = arith.divf %6, %7 : vector<64x1xf32>
    %9 = vector.broadcast %8 : vector<64x1xf32> to vector<64x32xf32>
    %10 = arith.subf %2, %9 : vector<64x32xf32>
    %11 = arith.mulf %10, %10 : vector<64x32xf32>
    %cst_7 = arith.constant dense<0.000000e+00> : vector<64xf32>
    %12 = vector.multi_reduction <add>, %11, %cst_7 [1] : vector<64x32xf32> to vector<64xf32>
    %13 = vector.shape_cast %12 : vector<64xf32> to vector<64x1xf32>
    %cst_8 = arith.constant 3.200000e+01 : f32
    %14 = vector.broadcast %cst_8 : f32 to vector<64x1xf32>
    %15 = arith.divf %13, %14 : vector<64x1xf32>
    %16 = vector.broadcast %8 : vector<64x1xf32> to vector<64x32xf32>
    %17 = arith.subf %2, %16 : vector<64x32xf32>
    %cst_9 = arith.constant 9.99999974E-6 : f32
    %18 = vector.broadcast %cst_9 : f32 to vector<64x1xf32>
    %19 = arith.addf %15, %18 : vector<64x1xf32>
    %20 = math.rsqrt %19 : vector<64x1xf32>
    %21 = vector.broadcast %20 : vector<64x1xf32> to vector<64x32xf32>
    %22 = arith.mulf %17, %21 : vector<64x32xf32>
    %23 = vector.broadcast %3 : vector<1x32xf32> to vector<64x32xf32>
    %24 = arith.mulf %22, %23 : vector<64x32xf32>
    %25 = vector.broadcast %4 : vector<1x32xf32> to vector<64x32xf32>
    %26 = arith.addf %24, %25 : vector<64x32xf32>
    %27 = arith.truncf %26 : vector<64x32xf32> to vector<64x32xbf16>
    %c0_10 = arith.constant 0 : index
    %c0_11 = arith.constant 0 : index
    %28 = vector.load %arg5[%c0_10, %c0_11] : memref<32x96xbf16, #tpu.memory_space<vmem>>, vector<32x96xbf16>
    %cst_12 = arith.constant dense<0.000000e+00> : vector<64x96xf32>
    %29 = tpu.matmul %27, %28, %cst_12 {dimension_numbers = #tpu.dot_dimension_numbers<[1], [0], [0], [1], [0, 0, 1, 1], [], []>} : vector<64x32xbf16>, vector<32x96xbf16>, vector<64x96xf32> -> vector<64x96xf32>
    %c0_13 = arith.constant 0 : index
    %c0_14 = arith.constant 0 : index
    %30 = vector.load %arg6[%c0_13, %c0_14] : memref<1x96xf32, #tpu.memory_space<vmem>>, vector<1x96xf32>
    %31 = vector.broadcast %30 : vector<1x96xf32> to vector<64x96xf32>
    %32 = arith.addf %29, %31 : vector<64x96xf32>
    %33 = arith.truncf %32 : vector<64x96xf32> to vector<64x96xbf16>
    %c0_15 = arith.constant 0 : index
    %c0_16 = arith.constant 0 : index
    %c0_17 = arith.constant 0 : index
    %34 = vector.load %arg7[%c0_15, %c0_16, %c0_17] : memref<1x64x96xbf16, #tpu.memory_space<vmem>>, vector<1x64x96xbf16>
    %35 = vector.shape_cast %34 : vector<1x64x96xbf16> to vector<64x96xbf16>
    %36 = vector.shape_cast %33 : vector<64x96xbf16> to vector<1x64x96xbf16>
    tpu.vector_store %arg7[%c0_15, %c0_16, %c0_17], %36 {strides = array<i32>} : memref<1x64x96xbf16, #tpu.memory_space<vmem>>, vector<1x64x96xbf16>,
    return
  }
  func.func @transform_0(%arg0: i32, %arg1: i32) -> (i32, i32, i32) {
    %c0_i32 = arith.constant 0 : i32
    %c0_i32_0 = arith.constant 0 : i32
    return %arg0, %arg1, %c0_i32 : i32, i32, i32
  }
  func.func @transform_1(%arg0: i32, %arg1: i32) -> (i32, i32) {
    %c0_i32 = arith.constant 0 : i32
    %c0_i32_0 = arith.constant 0 : i32
    %c0_i32_1 = arith.constant 0 : i32
    return %c0_i32, %c0_i32_0 : i32, i32
  }
  func.func @transform_2(%arg0: i32, %arg1: i32) -> (i32, i32) {
    %c0_i32 = arith.constant 0 : i32
    %c0_i32_0 = arith.constant 0 : i32
    %c0_i32_1 = arith.constant 0 : i32
    return %c0_i32, %c0_i32_0 : i32, i32
  }
  func.func @transform_3(%arg0: i32, %arg1: i32) -> (i32, i32) {
    %c0_i32 = arith.constant 0 : i32
    %c0_i32_0 = arith.constant 0 : i32
    %c0_i32_1 = arith.constant 0 : i32
    return %c0_i32, %c0_i32_0 : i32, i32
  }
  func.func @transform_4(%arg0: i32, %arg1: i32) -> (i32, i32) {
    %c0_i32 = arith.constant 0 : i32
    %c0_i32_0 = arith.constant 0 : i32
    %c0_i32_1 = arith.constant 0 : i32
    return %c0_i32, %c0_i32_0 : i32, i32
  }
  func.func @transform_5(%arg0: i32, %arg1: i32) -> (i32, i32, i32) {
    %c0_i32 = arith.constant 0 : i32
    %c0_i32_0 = arith.constant 0 : i32
    return %arg0, %arg1, %c0_i32 : i32, i32, i32
  }
}

module attributes {stable_mosaic.version = 11 : i64} {
  func.func @_ln1_qkv_kernel(%arg0: i32, %arg1: i32, %arg2: memref<1x64x32xbf16, #tpu.memory_space<vmem>>, %arg3: memref<1x32xf32, #tpu.memory_space<vmem>>, %arg4: memref<1x32xf32, #tpu.memory_space<vmem>>, %arg5: memref<32x96xbf16, #tpu.memory_space<vmem>>, %arg6: memref<1x96xf32, #tpu.memory_space<vmem>>, %arg7: memref<1x64x96xbf16, #tpu.memory_space<vmem>>) attributes {dimension_semantics = [#tpu.dimension_semantics<parallel>, #tpu.dimension_semantics<parallel>], iteration_bounds = array<i64: 2, 1>, scalar_prefetch = 0 : i64, scratch_operands = 0 : i64, tpu.core_type = #tpu.core_type<tc>, window_params = [{transform_indices = @transform_0, window_bounds = array<i64: 1, 64, 32>}, {pipeline_mode = #tpu.pipeline_mode<synchronous>, transform_indices = @transform_1, window_bounds = array<i64: 1, 32>}, {pipeline_mode = #tpu.pipeline_mode<synchronous>, transform_indices = @transform_2, window_bounds = array<i64: 1, 32>}, {pipeline_mode = #tpu.pipeline_mode<synchronous>, transform_indices = @transform_3, window_bounds = array<i64: 32, 96>}, {pipeline_mode = #tpu.pipeline_mode<synchronous>, transform_indices = @transform_4, window_bounds = array<i64: 1, 96>}, {transform_indices = @transform_5, window_bounds = array<i64: 1, 64, 96>}]} {
    %c0 = arith.constant 0 : index
    %c0_0 = arith.constant 0 : index
    %c0_1 = arith.constant 0 : index
    %0 = vector.load %arg2[%c0, %c0_0, %c0_1] : memref<1x64x32xbf16, #tpu.memory_space<vmem>>, vector<1x64x32xbf16>
    %1 = vector.shape_cast %0 : vector<1x64x32xbf16> to vector<64x32xbf16>
    %2 = arith.extf %1 : vector<64x32xbf16> to vector<64x32xf32>
    %c0_2 = arith.constant 0 : index
    %c0_3 = arith.constant 0 : index
    %3 = vector.load %arg3[%c0_2, %c0_3] : memref<1x32xf32, #tpu.memory_space<vmem>>, vector<1x32xf32>
    %c0_4 = arith.constant 0 : index
    %c0_5 = arith.constant 0 : index
    %4 = vector.load %arg4[%c0_4, %c0_5] : memref<1x32xf32, #tpu.memory_space<vmem>>, vector<1x32xf32>
    %cst = arith.constant dense<0.000000e+00> : vector<64xf32>
    %5 = vector.multi_reduction <add>, %2, %cst [1] : vector<64x32xf32> to vector<64xf32>
    %6 = vector.shape_cast %5 : vector<64xf32> to vector<64x1xf32>
    %cst_6 = arith.constant 3.200000e+01 : f32
    %7 = vector.broadcast %cst_6 : f32 to vector<64x1xf32>
    %8 = arith.divf %6, %7 : vector<64x1xf32>
    %9 = vector.broadcast %8 : vector<64x1xf32> to vector<64x32xf32>
    %10 = arith.subf %2, %9 : vector<64x32xf32>
    %11 = arith.mulf %10, %10 : vector<64x32xf32>
    %cst_7 = arith.constant dense<0.000000e+00> : vector<64xf32>
    %12 = vector.multi_reduction <add>, %11, %cst_7 [1] : vector<64x32xf32> to vector<64xf32>
    %13 = vector.shape_cast %12 : vector<64xf32> to vector<64x1xf32>
    %cst_8 = arith.constant 3.200000e+01 : f32
    %14 = vector.broadcast %cst_8 : f32 to vector<64x1xf32>
    %15 = arith.divf %13, %14 : vector<64x1xf32>
    %16 = vector.broadcast %8 : vector<64x1xf32> to vector<64x32xf32>
    %17 = arith.subf %2, %16 : vector<64x32xf32>
    %cst_9 = arith.constant 9.99999974E-6 : f32
    %18 = vector.broadcast %cst_9 : f32 to vector<64x1xf32>
    %19 = arith.addf %15, %18 : vector<64x1xf32>
    %20 = math.rsqrt %19 : vector<64x1xf32>
    %21 = vector.broadcast %20 : vector<64x1xf32> to vector<64x32xf32>
    %22 = arith.mulf %17, %21 : vector<64x32xf32>
    %23 = vector.broadcast %3 : vector<1x32xf32> to vector<64x32xf32>
    %24 = arith.mulf %22, %23 : vector<64x32xf32>
    %25 = vector.broadcast %4 : vector<1x32xf32> to vector<64x32xf32>
    %26 = arith.addf %24, %25 : vector<64x32xf32>
    %27 = arith.truncf %26 : vector<64x32xf32> to vector<64x32xbf16>
    %c0_10 = arith.constant 0 : index
    %c0_11 = arith.constant 0 : index
    %28 = vector.load %arg5[%c0_10, %c0_11] : memref<32x96xbf16, #tpu.memory_space<vmem>>, vector<32x96xbf16>
    %cst_12 = arith.constant dense<0.000000e+00> : vector<64x96xf32>
    %29 = tpu.matmul %27, %28, %cst_12 {dimension_numbers = #tpu.dot_dimension_numbers<[1], [0], [0], [1], [0, 0, 1, 1], [], []>} : vector<64x32xbf16>, vector<32x96xbf16>, vector<64x96xf32> -> vector<64x96xf32>
    %c0_13 = arith.constant 0 : index
    %c0_14 = arith.constant 0 : index
    %30 = vector.load %arg6[%c0_13, %c0_14] : memref<1x96xf32, #tpu.memory_space<vmem>>, vector<1x96xf32>
    %31 = vector.broadcast %30 : vector<1x96xf32> to vector<64x96xf32>
    %32 = arith.addf %29, %31 : vector<64x96xf32>
    %33 = arith.truncf %32 : vector<64x96xf32> to vector<64x96xbf16>
    %c0_15 = arith.constant 0 : index
    %c0_16 = arith.constant 0 : index
    %c0_17 = arith.constant 0 : index
    %34 = vector.load %arg7[%c0_15, %c0_16, %c0_17] : memref<1x64x96xbf16, #tpu.memory_space<vmem>>, vector<1x64x96xbf16>
    %35 = vector.shape_cast %34 : vector<1x64x96xbf16> to vector<64x96xbf16>
    %36 = vector.shape_cast %33 : vector<64x96xbf16> to vector<1x64x96xbf16>
    tpu.vector_store %arg7[%c0_15, %c0_16, %c0_17], %36 {strides = array<i32>} : memref<1x64x96xbf16, #tpu.memory_space<vmem>>, vector<1x64x96xbf16>,
    return
  }
  func.func @transform_0(%arg0: i32, %arg1: i32) -> (i32, i32, i32) {
    %c0_i32 = arith.constant 0 : i32
    %c0_i32_0 = arith.constant 0 : i32
    return %arg0, %arg1, %c0_i32 : i32, i32, i32
  }
  func.func @transform_1(%arg0: i32, %arg1: i32) -> (i32, i32) {
    %c0_i32 = arith.constant 0 : i32
    %c0_i32_0 = arith.constant 0 : i32
    %c0_i32_1 = arith.constant 0 : i32
    return %c0_i32, %c0_i32_0 : i32, i32
  }
  func.func @transform_2(%arg0: i32, %arg1: i32) -> (i32, i32) {
    %c0_i32 = arith.constant 0 : i32
    %c0_i32_0 = arith.constant 0 : i32
    %c0_i32_1 = arith.constant 0 : i32
    return %c0_i32, %c0_i32_0 : i32, i32
  }
  func.func @transform_3(%arg0: i32, %arg1: i32) -> (i32, i32) {
    %c0_i32 = arith.constant 0 : i32
    %c0_i32_0 = arith.constant 0 : i32
    %c0_i32_1 = arith.constant 0 : i32
    return %c0_i32, %c0_i32_0 : i32, i32
  }
  func.func @transform_4(%arg0: i32, %arg1: i32) -> (i32, i32) {
    %c0_i32 = arith.constant 0 : i32
    %c0_i32_0 = arith.constant 0 : i32
    %c0_i32_1 = arith.constant 0 : i32
    return %c0_i32, %c0_i32_0 : i32, i32
  }
  func.func @transform_5(%arg0: i32, %arg1: i32) -> (i32, i32, i32) {
    %c0_i32 = arith.constant 0 : i32
    %c0_i32_0 = arith.constant 0 : i32
    return %arg0, %arg1, %c0_i32 : i32, i32, i32
  }
}

</mosaic_0001>

<bundles_post_ra>
// kernel: tpu_custom_call.1
= control target key start
LH: loop header
LB: loop body
LE: loop exit
PB: predicated region body
PF: predicated region fallthrough
CT: control target
= control target key end

     0   :  { %10 = vsyncpa [#allocation3], 0  ;;  %s1118_s0 = inlined_call_operand.vmem [shape: bf16[2,64,32], index: 0, kind: input, shape index: {}]   ;;  %s1119_s1 = inlined_call_operand.vmem [shape: f32[1,32], index: 1, kind: input, shape index: {}]   ;;  %s1120_s2 = inlined_call_operand.vmem [shape: f32[1,32], index: 2, kind: input, shape index: {}]   ;;  %s1121_s3 = inlined_call_operand.vmem [shape: bf16[32,96], index: 3, kind: input, shape index: {}]   ;;  %s1122_s4 = inlined_call_operand.vmem [shape: f32[1,96], index: 4, kind: input, shape index: {}]   ;;  %s1123_s5 = inlined_call_operand.hbm [shape: bf16[2,64,96], index: 5, kind: output, shape index: {}]  }
   0x1   :  { %12 = vsyncpa [#allocation3 + $0x1], 0  ;;  %s916_s18 = smov 0   ;;  %s918_s19 = smov 0  }
   0x2   :  { %s920_s20 = smov 0   ;;  %s922_s21 = smov 0  }
   0x3   :  { %s924_s22 = smov 0   ;;  %s926_s23 = smov 0  }
   0x4 LB: > { %s647_s24 = sadd.s32 4294967295, %s881_s23   ;;  %s648_s25 = sadd.s32 4294967294, %s881_s23   ;;  %s881_s23 = sphi %s926_s23, %s18_s23   ;;  %s877_s22 = sphi %s924_s22, %s1130_s22   ;;  %s873_s21 = sphi %s922_s21, %s1129_s21   ;;  %s869_s20 = sphi %s920_s20, %s1128_s20   ;;  %s865_s19 = sphi %s918_s19, %s1127_s19   ;;  %s861_s18 = sphi %s916_s18, %s1126_s18  }
   0x5   : > { %s30_s26 = sadd.s32 1, %s877_s22  ;;  %s151_s27 = sadd.s32 1, %s869_s20 }
   0x6   : > { %p32_p0 = scmp.ge.s32.totalorder %s30_s26, 2  ;;  %p161_p1 = scmp.ne.s32.totalorder %s869_s20, %s865_s19 }
   0x7   : > { %p162_p2 = scmp.eq.s32.totalorder %s647_s24, 1  ;;  %p167_p3 = scmp.ne.s32.totalorder %s865_s19, %s861_s18 }
   0x8   : > { %s1132_s26 = smov (%p32_p0, %s30_s26), 0  ;;  %p168_p5 = scmp.eq.s32.totalorder %s648_s25, 1 }
   0x9   : > { %p956_p4 = por %p162_p2, %p161_p1  ;;  %s146_s29 = ssub.s32 %s877_s22, %s1132_s26 }
   0xa   : > { %p651_p6 = scmp.ge.s32.totalorder %s881_s23, 1  ;;  %p149_p7 = scmp.eq.s32.totalorder %s146_s29, 0 }
   0xb   : > { %p963_p8 = por %p168_p5, %p167_p3  ;;  %p211_p9 = scmp.lt.s32.totalorder %s881_s23, 3 }
   0xc   : > { %s969_s6 = scalar_select %p149_p7, %s869_s20, %s151_s27  }
   0xd   : > { %p212_p10 = pnand %p651_p6, %p211_p9 }
   0xe   : > { %p244_p11 = scmp.lt.s32.totalorder (!%p212_p10), %s873_s21, 1  ;;  %vm273_vm0 = vcmask (!%p212_p10), 261120   ;;  %v785_v60 = vld [vmem:[%s1121_s3] sm:$0xff] (!%p212_p10)   ;;  %v786_v61 = vld [vmem:[%s1121_s3 + $0x8] sm:$0xff] (!%p212_p10)   ;;  %s240_s27 = sand.u32 (!%p212_p10), 1, %s865_s19   ;;  %vm543_vm1 = vcmask (!%p212_p10), 781312  }
   0xf   : > { %215 = sbr.rel (%p212_p10) target bundleno = 594 (0x252), region = 40  ;;  %712 = vmatprep.subr.bf16.mxu0 (!%p212_p10), %v785_v60  ;;  %724 = vmatprep.subr.bf16.mxu1 (!%p212_p10), %v785_v60  ;;  %s686_s10 = sshll.u32 (!%p212_p10), %s873_s21, 9 }
  0x10   : > { %713 = vmatpush3.bf16.msra.mxu0 (!%p212_p10), %v785_v60  ;;  %726 = vmatpush3.bf16.msra.mxu1 (!%p212_p10), %v785_v60  ;;  %s1063_s14 = scalar_lea.hbm (!%p212_p10), %s1123_s5, %s686_s10  ;;  %s883_s16 = smov (!%p212_p10), [#allocation2]  }
  0x11   : > { %714 = vmatprep.subr.bf16.mxu0 (!%p212_p10), %v786_v61  ;;  %725 = vmatprep.subr.bf16.mxu1 (!%p212_p10), %v786_v61  ;;  %s807_s17 = sshll.u32 (!%p212_p10), %s883_s16, 4  ;;  %s808_s17 = int_to_ptr.vmem [resolvable:$false] %s807_s17 }
  0x12   : > { %s809_s24 = scalar_lea.vmem (!%p212_p10), %s808_s17, 1024 }
  0x14   : > { %715 = vmatpush3.bf16.msra.mxu0 (!%p212_p10), %v786_v61  ;;  %727 = vmatpush3.bf16.msra.mxu1 (!%p212_p10), %v786_v61 }
  0x16   : > { %s245_s7 = scalar_select %p244_p11, %s873_s21, 1 }
  0x17   : > { %s1072_s21 = scalar_lea.sflag [#allocation3], %s240_s27 }
  0x18   : > { %s677_s8 = sshll.u32 %s245_s7, 5 }
  0x19   : > { %s251_s11 = scalar_lea.vmem %s1118_s0, %s677_s8  ;;  %s652_s8 = sshll.u32 %s240_s27, 5 }
  0x1a   : > { %v688_v0 = vld [vmem:[%s251_s11] sm:$0xff]   ;;  %v704_v1 = vld [vmem:[%s251_s11 + $0x10] sm:$0xff]   ;;  %v703_v6 = vld [vmem:[%s251_s11 + $0x8] sm:$0xff]   ;;  %s242_s9 = scalar_lea.vmem [#allocation2], %s652_s8 }
  0x1b   : > { %v689_v2 = vunpack.c.l.bf16 %v688_v0  ;;  %v697_v3 = vunpack.c.l.bf16 %v704_v1  ;;  %v690_v4 = vunpack.c.h.bf16 %v688_v0  ;;  %v698_v5 = vunpack.c.h.bf16 %v704_v1  ;;  %v705_v13 = vld [vmem:[%s251_s11 + $0x18] sm:$0xff]   ;;  %s568_s11 = sshll.u32 %s242_s9, 4  ;;  %s1065_s11 = int_to_ptr.vmem [resolvable:$true] %s568_s11 }
  0x1c   : > { %v693_v11 = vunpack.c.l.bf16 %v703_v6  ;;  %v694_v12 = vunpack.c.h.bf16 %v703_v6  ;;  %v701_v16 = vunpack.c.l.bf16 %v705_v13  ;;  %v702_v17 = vunpack.c.h.bf16 %v705_v13  ;;  %s803_s15 = scalar_lea.vmem %s1065_s11, 512  ;;  %p810_p1 = scmp.lt.s32.totalorder %s1065_s11, %s808_s17 }
  0x1d   : > { %v274_v7 = vsel %vm273_vm0, %v689_v2, 0.0  ;;  %v286_v8 = vsel %vm273_vm0, %v697_v3, 0.0  ;;  %v277_v9 = vsel %vm273_vm0, %v690_v4, 0.0  ;;  %v289_v10 = vsel %vm273_vm0, %v698_v5, 0.0  ;;  %p804_p12 = scmp.ne.s32.totalorder %s1065_s11, %s803_s15  ;;  %p811_p2 = scmp.lt.s32.totalorder %s809_s24, %s803_s15 }
  0x1e   : > { %275 = vadd.xlane.f32.xlu0 %v274_v7  ;;  %287 = vadd.xlane.f32.xlu1 %v286_v8  ;;  %v280_v14 = vsel %vm273_vm0, %v693_v11, 0.0  ;;  %v283_v15 = vsel %vm273_vm0, %v694_v12, 0.0  ;;  %v292_v18 = vsel %vm273_vm0, %v701_v16, 0.0  ;;  %v295_v19 = vsel %vm273_vm0, %v702_v17, 0.0 }
  0x1f   : > { %p805_p13 = pnand %p804_p12, %p956_p4  ;;  %p812_p3 = por %p811_p2, %p810_p1 }
  0x21   : > { %p806_p0 = pneg %p805_p13 }
  0x22   : > { %278 = vadd.xlane.f32.xlu0 %v277_v9  ;;  %290 = vadd.xlane.f32.xlu1 %v289_v10 }
  0x23   : > { %p813_p5 = pnand %p812_p3, %p806_p0 }
  0x26   : > { %281 = vadd.xlane.f32.xlu0 %v280_v14  ;;  %284 = vadd.xlane.f32.xlu1 %v283_v15 }
  0x2a   : > { %293 = vadd.xlane.f32.xlu0 %v292_v18  ;;  %296 = vadd.xlane.f32.xlu1 %v295_v19 }
  0xab   : > { %v276_v20 = vpop.xlane.xlu0 %275  ;;  %v288_v21 = vpop.xlane.xlu1 %287 }
  0xac   : > { %v299_v22 = vmul.f32 0.03125, %v276_v20  ;;  %v303_v23 = vmul.f32 0.03125, %v288_v21 }
  0xae   : > { %v984_v24 = vsub.f32 %v689_v2, %v299_v22  ;;  %v986_v25 = vsub.f32 %v697_v3, %v303_v23  ;;  %v655_v23 = vld [vmem:[%s1119_s1] ss:$0 sm:$0xff] }
  0xaf   : > { %v279_v26 = vpop.xlane.xlu0 %278  ;;  %v291_v27 = vpop.xlane.xlu1 %290 }
  0xb0   : > { %v300_v28 = vmul.f32 0.03125, %v279_v26  ;;  %v304_v29 = vmul.f32 0.03125, %v291_v27  ;;  %v315_v30 = vmul.f32 %v984_v24, %v984_v24  ;;  %v319_v31 = vmul.f32 %v986_v25, %v986_v25 }
  0xb2   : > { %v992_v32 = vsub.f32 %v690_v4, %v300_v28  ;;  %v994_v33 = vsub.f32 %v698_v5, %v304_v29  ;;  %v323_v34 = vsel %vm273_vm0, %v315_v30, 0.0  ;;  %v335_v37 = vsel %vm273_vm0, %v319_v31, 0.0  ;;  %v656_v31 = vld [vmem:[%s1120_s2] ss:$0 sm:$0xff] }
  0xb3   : > { %324 = vadd.xlane.f32.xlu0 %v323_v34  ;;  %v282_v35 = vpop.xlane.xlu0 %281  ;;  %v285_v36 = vpop.xlane.xlu1 %284 }
  0xb4   : > { %v301_v38 = vmul.f32 0.03125, %v282_v35  ;;  %v302_v39 = vmul.f32 0.03125, %v285_v36  ;;  %v316_v40 = vmul.f32 %v992_v32, %v992_v32  ;;  %v320_v41 = vmul.f32 %v994_v33, %v994_v33 }
  0xb6   : > { %v1002_v42 = vsub.f32 %v693_v11, %v301_v38  ;;  %v1004_v43 = vsub.f32 %v694_v12, %v302_v39  ;;  %v326_v44 = vsel %vm273_vm0, %v316_v40, 0.0  ;;  %v338_v47 = vsel %vm273_vm0, %v320_v41, 0.0 }
  0xb7   : > { %336 = vadd.xlane.f32.xlu0 %v335_v37  ;;  %327 = vadd.xlane.f32.xlu1 %v326_v44  ;;  %v294_v45 = vpop.xlane.xlu0 %293  ;;  %v297_v46 = vpop.xlane.xlu1 %296 }
  0xb8   : > { %v305_v48 = vmul.f32 0.03125, %v294_v45  ;;  %v306_v49 = vmul.f32 0.03125, %v297_v46  ;;  %v317_v50 = vmul.f32 %v1002_v42, %v1002_v42  ;;  %v318_v51 = vmul.f32 %v1004_v43, %v1004_v43 }
  0xba   : > { %v1012_v52 = vsub.f32 %v701_v16, %v305_v48  ;;  %v1014_v53 = vsub.f32 %v702_v17, %v306_v49  ;;  %v329_v54 = vsel %vm273_vm0, %v317_v50, 0.0  ;;  %v332_v55 = vsel %vm273_vm0, %v318_v51, 0.0 }
  0xbb   : > { %339 = vadd.xlane.f32.xlu1 %v338_v47  ;;  %330 = vadd.xlane.f32.xlu0 %v329_v54 }
  0xbc   : > { %v321_v56 = vmul.f32 %v1012_v52, %v1012_v52  ;;  %v322_v57 = vmul.f32 %v1014_v53, %v1014_v53 }
  0xbe   : > { %v341_v58 = vsel %vm273_vm0, %v321_v56, 0.0  ;;  %v344_v59 = vsel %vm273_vm0, %v322_v57, 0.0 }
  0xbf   : > { %333 = vadd.xlane.f32.xlu1 %v332_v55  ;;  %342 = vadd.xlane.f32.xlu0 %v341_v58 }
  0xc3   : > { %345 = vadd.xlane.f32.xlu1 %v344_v59 }
 0x140   : > { %v325_v62 = vpop.xlane.xlu0 %324 }
 0x141   : > { %v347_v63 = vmul.f32 0.03125, %v325_v62 }
 0x143   : > { %v355_v0 = vadd.f32 1e-05, %v347_v63 }
 0x144   : > { %v328_v1 = vpop.xlane.xlu1 %327  ;;  %v337_v2 = vpop.xlane.xlu0 %336 }
 0x145   : > { %787 = vrsqrt.f32 %v355_v0  ;;  %v348_v3 = vmul.f32 0.03125, %v328_v1  ;;  %v351_v4 = vmul.f32 0.03125, %v337_v2 }
 0x147   : > { %v356_v5 = vadd.f32 1e-05, %v348_v3  ;;  %v359_v6 = vadd.f32 1e-05, %v351_v4 }
 0x148   : > { %v340_v7 = vpop.xlane.xlu1 %339  ;;  %v331_v8 = vpop.xlane.xlu0 %330 }
 0x149   : > { %789 = vrsqrt.f32 %v356_v5  ;;  %v352_v9 = vmul.f32 0.03125, %v340_v7  ;;  %v349_v10 = vmul.f32 0.03125, %v331_v8 }
 0x14a   : > { %791 = vrsqrt.f32 %v359_v6 }
 0x14b   : > { %v360_v11 = vadd.f32 1e-05, %v352_v9  ;;  %v357_v12 = vadd.f32 1e-05, %v349_v10 }
 0x14c   : > { %v334_v13 = vpop.xlane.xlu1 %333  ;;  %v343_v14 = vpop.xlane.xlu0 %342 }
 0x14d   : > { %793 = vrsqrt.f32 %v360_v11  ;;  %v350_v15 = vmul.f32 0.03125, %v334_v13  ;;  %v353_v16 = vmul.f32 0.03125, %v343_v14 }
 0x14e   : > { %795 = vrsqrt.f32 %v357_v12 }
 0x14f   : > { %v788_v17 = vpop.eup %787  ;;  %v358_v18 = vadd.f32 1e-05, %v350_v15  ;;  %v361_v19 = vadd.f32 1e-05, %v353_v16 }
 0x150   : > { %v346_v20 = vpop.xlane.xlu1 %345  ;;  %v371_v21 = vmul.f32 %v788_v17, %v984_v24 }
 0x151   : > { %797 = vrsqrt.f32 %v358_v18  ;;  %v354_v22 = vmul.f32 0.03125, %v346_v20 }
 0x152   : > { %799 = vrsqrt.f32 %v361_v19  ;;  %v385_v30 = vmul.f32 %v655_v23, %v371_v21 }
 0x153   : > { %v790_v26 = vpop.eup %789  ;;  %v362_v27 = vadd.f32 1e-05, %v354_v22 }
 0x154   : > { %v792_v28 = vpop.eup %791  ;;  %v372_v29 = vmul.f32 %v790_v26, %v992_v32  ;;  %v399_v37 = vadd.f32 %v656_v31, %v385_v30 }
 0x155   : > { %801 = vrsqrt.f32 %v362_v27  ;;  %v375_v24 = vmul.f32 %v792_v28, %v986_v25 }
 0x156   : > { %v386_v34 = vmul.f32 %v655_v23, %v372_v29 }
 0x157   : > { %v794_v35 = vpop.eup %793  ;;  %v389_v40 = vmul.f32 %v655_v23, %v375_v24 }
 0x158   : > { %v796_v36 = vpop.eup %795  ;;  %v400_v38 = vadd.f32 %v656_v31, %v386_v34  ;;  %v376_v39 = vmul.f32 %v794_v35, %v994_v33 }
 0x159   : > { %v373_v41 = vmul.f32 %v796_v36, %v1002_v42  ;;  %v403_v48 = vadd.f32 %v656_v31, %v389_v40 }
 0x15a   : > { %v407_v44 = vpack.c.bf16 %v400_v38, %v399_v37  ;;  %v390_v32 = vmul.f32 %v655_v23, %v376_v39 }
 0x15b   : > { %v798_v45 = vpop.eup %797  ;;  %v387_v49 = vmul.f32 %v655_v23, %v373_v41 }
 0x15c   : > { %v800_v46 = vpop.eup %799  ;;  %v374_v47 = vmul.f32 %v798_v45, %v1004_v43  ;;  %716 = vmatprep.mubr.msk.bf16.mxu0 %vm273_vm0, %v407_v44  ;;  %v404_v25 = vadd.f32 %v656_v31, %v390_v32 }
 0x15d   : > { %v377_v50 = vmul.f32 %v800_v46, %v1012_v52  ;;  %v401_v55 = vadd.f32 %v656_v31, %v387_v49  ;;  %v657_v52 = vld [vmem:[%s1122_s4] ss:$0 sm:$0xff] }
 0x15e   : > { %v409_v51 = vpack.c.bf16 %v404_v25, %v403_v48  ;;  %v388_v54 = vmul.f32 %v655_v23, %v374_v47 }
 0x15f   : > { %v802_v33 = vpop.eup %801  ;;  %v391_v57 = vmul.f32 %v655_v23, %v377_v50 }
 0x160   : > { %v378_v42 = vmul.f32 %v802_v33, %v1014_v53  ;;  %720 = vmatprep.mubr.msk.bf16.mxu1 %vm273_vm0, %v409_v51  ;;  %v402_v56 = vadd.f32 %v656_v31, %v388_v54 }
 0x161   : > { %v405_v59 = vadd.f32 %v656_v31, %v391_v57 }
 0x162   : > { %v408_v43 = vpack.c.bf16 %v402_v56, %v401_v55  ;;  %v392_v58 = vmul.f32 %v655_v23, %v378_v42 }
 0x164   : > { %717 = vmatmul.mubr.msk.bf16.vlgmr.msra.gmra.mrb[0].mxu0 %vm273_vm0, %v408_v43  ;;  %v406_v60 = vadd.f32 %v656_v31, %v392_v58 }
 0x166   : > { %v410_v61 = vpack.c.bf16 %v406_v60, %v405_v59 }
 0x168   : > { %721 = vmatmul.mubr.msk.bf16.vlgmr.msra.gmra.mrb[0].mxu1 %vm273_vm0, %v410_v61 }
 0x237   : > { %v718_v53 = vpop.f32.mrb[0].mxu0 }
 0x238   : > { %v489_v62 = vadd.f32 %v718_v53, %v657_v52  ;;  %v480_v63 = vpop.f32.mrb[1].mxu0 }
 0x239   : > { %v481_v0 = vadd.f32 %v657_v52, %v480_v63  ;;  %v719_v1 = vpop.f32.mrb[2].mxu0 }
 0x23a   : > { %v680_v2 = vpack.c.bf16 %v489_v62, %v489_v62  ;;  %v492_v3 = vadd.f32 %v719_v1, %v657_v52  ;;  %v483_v4 = vpop.f32.mrb[3].mxu0 }
 0x23b   : > { %v678_v5 = vpack.c.bf16 %v481_v0, %v481_v0  ;;  %v484_v6 = vadd.f32 %v657_v52, %v483_v4  ;;  %v722_v7 = vpop.f32.mrb[0].mxu1 }
 0x23c   : > { %546 = vst.msk [vmem:[%s242_s9 + $0x8] sm:$0xf] %vm543_vm1, %v680_v2  ;;  %v681_v8 = vpack.c.bf16 %v492_v3, %v492_v3  ;;  %v505_v9 = vadd.f32 %v722_v7, %v657_v52  ;;  %v496_v10 = vpop.f32.mrb[1].mxu1 }
 0x23d   : > { %544 = vst.msk [vmem:[%s242_s9] sm:$0xf] %vm543_vm1, %v678_v5  ;;  %v679_v11 = vpack.c.bf16 %v484_v6, %v484_v6  ;;  %v497_v12 = vadd.f32 %v657_v52, %v496_v10  ;;  %v723_v13 = vpop.f32.mrb[2].mxu1 }
 0x23e   : > { %547 = vst.msk [vmem:[%s242_s9 + $0xc] sm:$0xf] %vm543_vm1, %v681_v8  ;;  %v684_v14 = vpack.c.bf16 %v505_v9, %v505_v9  ;;  %v508_v15 = vadd.f32 %v723_v13, %v657_v52  ;;  %v499_v16 = vpop.f32.mrb[3].mxu1 }
 0x23f   : > { %545 = vst.msk [vmem:[%s242_s9 + $0x4] sm:$0xf] %vm543_vm1, %v679_v11  ;;  %v682_v17 = vpack.c.bf16 %v497_v12, %v497_v12  ;;  %v500_v18 = vadd.f32 %v657_v52, %v499_v16 }
 0x240   : > { %550 = vst.msk [vmem:[%s242_s9 + $0x18] sm:$0xf] %vm543_vm1, %v684_v14  ;;  %v685_v19 = vpack.c.bf16 %v508_v15, %v508_v15 }
 0x241   : > { %548 = vst.msk [vmem:[%s242_s9 + $0x10] sm:$0xf] %vm543_vm1, %v682_v17  ;;  %v683_v20 = vpack.c.bf16 %v500_v18, %v500_v18 }
 0x242   : > { %551 = vst.msk [vmem:[%s242_s9 + $0x1c] sm:$0xf] %vm543_vm1, %v685_v19 }
 0x243   : > { %549 = vst.msk [vmem:[%s242_s9 + $0x14] sm:$0xf] %vm543_vm1, %v683_v20 }
 0x244   : > { %816 = shalt.err (!%p813_p5)
}
 0x245   : > { %s817_s25 = scalar_lea.hbm %s1063_s14, 512  ;;  %s821_s7 = scalar_lea.hbm %s1123_s5, 1024 }
 0x246   : > { %p818_p6 = scmp.ne.s32.totalorder %s1063_s14, %s817_s25  ;;  %p822_p10 = scmp.lt.u32.totalorder %s1063_s14, %s1123_s5 }
 0x247   : > { %p823_p11 = scmp.lt.u32.totalorder %s821_s7, %s817_s25  ;;  %p825_p13 = scmp.lt.u32.totalorder %s817_s25, %s1063_s14 }
 0x248   : > { %p819_p7 = pnand %p818_p6, %p956_p4 }
 0x249   : > { %p824_p12 = por %p823_p11, %p822_p10 }
 0x24a   : > { %p820_p9 = pneg %p819_p7 }
 0x24b   : > { %p826_p0 = por %p825_p13, %p824_p12 }
 0x24d   : > { %p827_p1 = pnand %p826_p0, %p820_p9 }
 0x24f   : > { %830 = shalt.err (!%p827_p1)
}
 0x250   : > { %s884_s10 = smov 64   ;;  %s885_s12 = smov 4  }
 0x251   : > { %728 = dma.vmem_to_hbm [thread:$0]  (%p956_p4), %s1065_s11, 512, %s1063_s14, %s1072_s21, %s884_s10, %s884_s10, %s885_s12  }
 0x252 PF: > { %p734_p2 = scmp.ge.s32.totalorder %s881_s23, 2  ;;  %s583_s13 = sand.u32 1, %s861_s18  }
 0x253   : > { %s584_s15 = scalar_lea.sflag [#allocation3], %s583_s13 }
 0x254   : > { %p731_p3 = pnand %p734_p2, %p963_p8 }
 0x256   : > { %856 = dma.done.wait (!%p731_p3), %s584_s15, 512  }
 0x257   : > { %858 = vsyncadd (!%p731_p3), %s584_s15, 4294966784  ;;  %s18_s23 = sadd.s32 1, %s881_s23   ;;  %s1126_s18 = smov %s865_s19 }
 0x258   : > { %p15_p5 = scmp.ge.s32.totalorder %s18_s23, 4   ;;  %s1127_s19 = smov %s869_s20 }
 0x259   : > { %s1128_s20 = smov %s969_s6  ;;  %s1129_s21 = smov %s877_s22 }
 0x25a   : > { %s1130_s22 = smov %s1132_s26  ;;  %17 = sbr.rel (!%p15_p5) target bundleno = 4 (0x4), region = 75 }
 0x261   :  { %589 = vsyncpa [#allocation3], 1 }
 0x262   :  { %591 = vsyncpa [#allocation3 + $0x1], 1 }

// kernel: tpu_custom_call.1
= control target key start
LH: loop header
LB: loop body
LE: loop exit
PB: predicated region body
PF: predicated region fallthrough
CT: control target
= control target key end

     0   :  { %10 = vsyncpa [#allocation3], 0  ;;  %s1118_s0 = inlined_call_operand.vmem [shape: bf16[2,64,32], index: 0, kind: input, shape index: {}]   ;;  %s1119_s1 = inlined_call_operand.vmem [shape: f32[1,32], index: 1, kind: input, shape index: {}]   ;;  %s1120_s2 = inlined_call_operand.vmem [shape: f32[1,32], index: 2, kind: input, shape index: {}]   ;;  %s1121_s3 = inlined_call_operand.vmem [shape: bf16[32,96], index: 3, kind: input, shape index: {}]   ;;  %s1122_s4 = inlined_call_operand.vmem [shape: f32[1,96], index: 4, kind: input, shape index: {}]   ;;  %s1123_s5 = inlined_call_operand.hbm [shape: bf16[2,64,96], index: 5, kind: output, shape index: {}]  }
   0x1   :  { %12 = vsyncpa [#allocation3 + $0x1], 0  ;;  %s916_s18 = smov 0   ;;  %s918_s19 = smov 0  }
   0x2   :  { %s920_s20 = smov 0   ;;  %s922_s21 = smov 0  }
   0x3   :  { %s924_s22 = smov 0   ;;  %s926_s23 = smov 0  }
   0x4 LB: > { %s647_s24 = sadd.s32 4294967295, %s881_s23   ;;  %s648_s25 = sadd.s32 4294967294, %s881_s23   ;;  %s881_s23 = sphi %s926_s23, %s18_s23   ;;  %s877_s22 = sphi %s924_s22, %s1130_s22   ;;  %s873_s21 = sphi %s922_s21, %s1129_s21   ;;  %s869_s20 = sphi %s920_s20, %s1128_s20   ;;  %s865_s19 = sphi %s918_s19, %s1127_s19   ;;  %s861_s18 = sphi %s916_s18, %s1126_s18  }
   0x5   : > { %s30_s26 = sadd.s32 1, %s877_s22  ;;  %s151_s27 = sadd.s32 1, %s869_s20 }
   0x6   : > { %p32_p0 = scmp.ge.s32.totalorder %s30_s26, 2  ;;  %p161_p1 = scmp.ne.s32.totalorder %s869_s20, %s865_s19 }
   0x7   : > { %p162_p2 = scmp.eq.s32.totalorder %s647_s24, 1  ;;  %p167_p3 = scmp.ne.s32.totalorder %s865_s19, %s861_s18 }
   0x8   : > { %s1132_s26 = smov (%p32_p0, %s30_s26), 0  ;;  %p168_p5 = scmp.eq.s32.totalorder %s648_s25, 1 }
   0x9   : > { %p956_p4 = por %p162_p2, %p161_p1  ;;  %s146_s29 = ssub.s32 %s877_s22, %s1132_s26 }
   0xa   : > { %p651_p6 = scmp.ge.s32.totalorder %s881_s23, 1  ;;  %p149_p7 = scmp.eq.s32.totalorder %s146_s29, 0 }
   0xb   : > { %p963_p8 = por %p168_p5, %p167_p3  ;;  %p211_p9 = scmp.lt.s32.totalorder %s881_s23, 3 }
   0xc   : > { %s969_s6 = scalar_select %p149_p7, %s869_s20, %s151_s27  }
   0xd   : > { %p212_p10 = pnand %p651_p6, %p211_p9 }
   0xe   : > { %p244_p11 = scmp.lt.s32.totalorder (!%p212_p10), %s873_s21, 1  ;;  %vm273_vm0 = vcmask (!%p212_p10), 261120   ;;  %v785_v60 = vld [vmem:[%s1121_s3] sm:$0xff] (!%p212_p10)   ;;  %v786_v61 = vld [vmem:[%s1121_s3 + $0x8] sm:$0xff] (!%p212_p10)   ;;  %s240_s27 = sand.u32 (!%p212_p10), 1, %s865_s19   ;;  %vm543_vm1 = vcmask (!%p212_p10), 781312  }
   0xf   : > { %215 = sbr.rel (%p212_p10) target bundleno = 594 (0x252), region = 40  ;;  %712 = vmatprep.subr.bf16.mxu0 (!%p212_p10), %v785_v60  ;;  %724 = vmatprep.subr.bf16.mxu1 (!%p212_p10), %v785_v60  ;;  %s686_s10 = sshll.u32 (!%p212_p10), %s873_s21, 9 }
  0x10   : > { %713 = vmatpush3.bf16.msra.mxu0 (!%p212_p10), %v785_v60  ;;  %726 = vmatpush3.bf16.msra.mxu1 (!%p212_p10), %v785_v60  ;;  %s1063_s14 = scalar_lea.hbm (!%p212_p10), %s1123_s5, %s686_s10  ;;  %s883_s16 = smov (!%p212_p10), [#allocation2]  }
  0x11   : > { %714 = vmatprep.subr.bf16.mxu0 (!%p212_p10), %v786_v61  ;;  %725 = vmatprep.subr.bf16.mxu1 (!%p212_p10), %v786_v61  ;;  %s807_s17 = sshll.u32 (!%p212_p10), %s883_s16, 4  ;;  %s808_s17 = int_to_ptr.vmem [resolvable:$false] %s807_s17 }
  0x12   : > { %s809_s24 = scalar_lea.vmem (!%p212_p10), %s808_s17, 1024 }
  0x14   : > { %715 = vmatpush3.bf16.msra.mxu0 (!%p212_p10), %v786_v61  ;;  %727 = vmatpush3.bf16.msra.mxu1 (!%p212_p10), %v786_v61 }
  0x16   : > { %s245_s7 = scalar_select %p244_p11, %s873_s21, 1 }
  0x17   : > { %s1072_s21 = scalar_lea.sflag [#allocation3], %s240_s27 }
  0x18   : > { %s677_s8 = sshll.u32 %s245_s7, 5 }
  0x19   : > { %s251_s11 = scalar_lea.vmem %s1118_s0, %s677_s8  ;;  %s652_s8 = sshll.u32 %s240_s27, 5 }
  0x1a   : > { %v688_v0 = vld [vmem:[%s251_s11] sm:$0xff]   ;;  %v704_v1 = vld [vmem:[%s251_s11 + $0x10] sm:$0xff]   ;;  %v703_v6 = vld [vmem:[%s251_s11 + $0x8] sm:$0xff]   ;;  %s242_s9 = scalar_lea.vmem [#allocation2], %s652_s8 }
  0x1b   : > { %v689_v2 = vunpack.c.l.bf16 %v688_v0  ;;  %v697_v3 = vunpack.c.l.bf16 %v704_v1  ;;  %v690_v4 = vunpack.c.h.bf16 %v688_v0  ;;  %v698_v5 = vunpack.c.h.bf16 %v704_v1  ;;  %v705_v13 = vld [vmem:[%s251_s11 + $0x18] sm:$0xff]   ;;  %s568_s11 = sshll.u32 %s242_s9, 4  ;;  %s1065_s11 = int_to_ptr.vmem [resolvable:$true] %s568_s11 }
  0x1c   : > { %v693_v11 = vunpack.c.l.bf16 %v703_v6  ;;  %v694_v12 = vunpack.c.h.bf16 %v703_v6  ;;  %v701_v16 = vunpack.c.l.bf16 %v705_v13  ;;  %v702_v17 = vunpack.c.h.bf16 %v705_v13  ;;  %s803_s15 = scalar_lea.vmem %s1065_s11, 512  ;;  %p810_p1 = scmp.lt.s32.totalorder %s1065_s11, %s808_s17 }
  0x1d   : > { %v274_v7 = vsel %vm273_vm0, %v689_v2, 0.0  ;;  %v286_v8 = vsel %vm273_vm0, %v697_v3, 0.0  ;;  %v277_v9 = vsel %vm273_vm0, %v690_v4, 0.0  ;;  %v289_v10 = vsel %vm273_vm0, %v698_v5, 0.0  ;;  %p804_p12 = scmp.ne.s32.totalorder %s1065_s11, %s803_s15  ;;  %p811_p2 = scmp.lt.s32.totalorder %s809_s24, %s803_s15 }
  0x1e   : > { %275 = vadd.xlane.f32.xlu0 %v274_v7  ;;  %287 = vadd.xlane.f32.xlu1 %v286_v8  ;;  %v280_v14 = vsel %vm273_vm0, %v693_v11, 0.0  ;;  %v283_v15 = vsel %vm273_vm0, %v694_v12, 0.0  ;;  %v292_v18 = vsel %vm273_vm0, %v701_v16, 0.0  ;;  %v295_v19 = vsel %vm273_vm0, %v702_v17, 0.0 }
  0x1f   : > { %p805_p13 = pnand %p804_p12, %p956_p4  ;;  %p812_p3 = por %p811_p2, %p810_p1 }
  0x21   : > { %p806_p0 = pneg %p805_p13 }
  0x22   : > { %278 = vadd.xlane.f32.xlu0 %v277_v9  ;;  %290 = vadd.xlane.f32.xlu1 %v289_v10 }
  0x23   : > { %p813_p5 = pnand %p812_p3, %p806_p0 }
  0x26   : > { %281 = vadd.xlane.f32.xlu0 %v280_v14  ;;  %284 = vadd.xlane.f32.xlu1 %v283_v15 }
  0x2a   : > { %293 = vadd.xlane.f32.xlu0 %v292_v18  ;;  %296 = vadd.xlane.f32.xlu1 %v295_v19 }
  0xab   : > { %v276_v20 = vpop.xlane.xlu0 %275  ;;  %v288_v21 = vpop.xlane.xlu1 %287 }
  0xac   : > { %v299_v22 = vmul.f32 0.03125, %v276_v20  ;;  %v303_v23 = vmul.f32 0.03125, %v288_v21 }
  0xae   : > { %v984_v24 = vsub.f32 %v689_v2, %v299_v22  ;;  %v986_v25 = vsub.f32 %v697_v3, %v303_v23  ;;  %v655_v23 = vld [vmem:[%s1119_s1] ss:$0 sm:$0xff] }
  0xaf   : > { %v279_v26 = vpop.xlane.xlu0 %278  ;;  %v291_v27 = vpop.xlane.xlu1 %290 }
  0xb0   : > { %v300_v28 = vmul.f32 0.03125, %v279_v26  ;;  %v304_v29 = vmul.f32 0.03125, %v291_v27  ;;  %v315_v30 = vmul.f32 %v984_v24, %v984_v24  ;;  %v319_v31 = vmul.f32 %v986_v25, %v986_v25 }
  0xb2   : > { %v992_v32 = vsub.f32 %v690_v4, %v300_v28  ;;  %v994_v33 = vsub.f32 %v698_v5, %v304_v29  ;;  %v323_v34 = vsel %vm273_vm0, %v315_v30, 0.0  ;;  %v335_v37 = vsel %vm273_vm0, %v319_v31, 0.0  ;;  %v656_v31 = vld [vmem:[%s1120_s2] ss:$0 sm:$0xff] }
  0xb3   : > { %324 = vadd.xlane.f32.xlu0 %v323_v34  ;;  %v282_v35 = vpop.xlane.xlu0 %281  ;;  %v285_v36 = vpop.xlane.xlu1 %284 }
  0xb4   : > { %v301_v38 = vmul.f32 0.03125, %v282_v35  ;;  %v302_v39 = vmul.f32 0.03125, %v285_v36  ;;  %v316_v40 = vmul.f32 %v992_v32, %v992_v32  ;;  %v320_v41 = vmul.f32 %v994_v33, %v994_v33 }
  0xb6   : > { %v1002_v42 = vsub.f32 %v693_v11, %v301_v38  ;;  %v1004_v43 = vsub.f32 %v694_v12, %v302_v39  ;;  %v326_v44 = vsel %vm273_vm0, %v316_v40, 0.0  ;;  %v338_v47 = vsel %vm273_vm0, %v320_v41, 0.0 }
  0xb7   : > { %336 = vadd.xlane.f32.xlu0 %v335_v37  ;;  %327 = vadd.xlane.f32.xlu1 %v326_v44  ;;  %v294_v45 = vpop.xlane.xlu0 %293  ;;  %v297_v46 = vpop.xlane.xlu1 %296 }
  0xb8   : > { %v305_v48 = vmul.f32 0.03125, %v294_v45  ;;  %v306_v49 = vmul.f32 0.03125, %v297_v46  ;;  %v317_v50 = vmul.f32 %v1002_v42, %v1002_v42  ;;  %v318_v51 = vmul.f32 %v1004_v43, %v1004_v43 }
  0xba   : > { %v1012_v52 = vsub.f32 %v701_v16, %v305_v48  ;;  %v1014_v53 = vsub.f32 %v702_v17, %v306_v49  ;;  %v329_v54 = vsel %vm273_vm0, %v317_v50, 0.0  ;;  %v332_v55 = vsel %vm273_vm0, %v318_v51, 0.0 }
  0xbb   : > { %339 = vadd.xlane.f32.xlu1 %v338_v47  ;;  %330 = vadd.xlane.f32.xlu0 %v329_v54 }
  0xbc   : > { %v321_v56 = vmul.f32 %v1012_v52, %v1012_v52  ;;  %v322_v57 = vmul.f32 %v1014_v53, %v1014_v53 }
  0xbe   : > { %v341_v58 = vsel %vm273_vm0, %v321_v56, 0.0  ;;  %v344_v59 = vsel %vm273_vm0, %v322_v57, 0.0 }
  0xbf   : > { %333 = vadd.xlane.f32.xlu1 %v332_v55  ;;  %342 = vadd.xlane.f32.xlu0 %v341_v58 }
  0xc3   : > { %345 = vadd.xlane.f32.xlu1 %v344_v59 }
 0x140   : > { %v325_v62 = vpop.xlane.xlu0 %324 }
 0x141   : > { %v347_v63 = vmul.f32 0.03125, %v325_v62 }
 0x143   : > { %v355_v0 = vadd.f32 1e-05, %v347_v63 }
 0x144   : > { %v328_v1 = vpop.xlane.xlu1 %327  ;;  %v337_v2 = vpop.xlane.xlu0 %336 }
 0x145   : > { %787 = vrsqrt.f32 %v355_v0  ;;  %v348_v3 = vmul.f32 0.03125, %v328_v1  ;;  %v351_v4 = vmul.f32 0.03125, %v337_v2 }
 0x147   : > { %v356_v5 = vadd.f32 1e-05, %v348_v3  ;;  %v359_v6 = vadd.f32 1e-05, %v351_v4 }
 0x148   : > { %v340_v7 = vpop.xlane.xlu1 %339  ;;  %v331_v8 = vpop.xlane.xlu0 %330 }
 0x149   : > { %789 = vrsqrt.f32 %v356_v5  ;;  %v352_v9 = vmul.f32 0.03125, %v340_v7  ;;  %v349_v10 = vmul.f32 0.03125, %v331_v8 }
 0x14a   : > { %791 = vrsqrt.f32 %v359_v6 }
 0x14b   : > { %v360_v11 = vadd.f32 1e-05, %v352_v9  ;;  %v357_v12 = vadd.f32 1e-05, %v349_v10 }
 0x14c   : > { %v334_v13 = vpop.xlane.xlu1 %333  ;;  %v343_v14 = vpop.xlane.xlu0 %342 }
 0x14d   : > { %793 = vrsqrt.f32 %v360_v11  ;;  %v350_v15 = vmul.f32 0.03125, %v334_v13  ;;  %v353_v16 = vmul.f32 0.03125, %v343_v14 }
 0x14e   : > { %795 = vrsqrt.f32 %v357_v12 }
 0x14f   : > { %v788_v17 = vpop.eup %787  ;;  %v358_v18 = vadd.f32 1e-05, %v350_v15  ;;  %v361_v19 = vadd.f32 1e-05, %v353_v16 }
 0x150   : > { %v346_v20 = vpop.xlane.xlu1 %345  ;;  %v371_v21 = vmul.f32 %v788_v17, %v984_v24 }
 0x151   : > { %797 = vrsqrt.f32 %v358_v18  ;;  %v354_v22 = vmul.f32 0.03125, %v346_v20 }
 0x152   : > { %799 = vrsqrt.f32 %v361_v19  ;;  %v385_v30 = vmul.f32 %v655_v23, %v371_v21 }
 0x153   : > { %v790_v26 = vpop.eup %789  ;;  %v362_v27 = vadd.f32 1e-05, %v354_v22 }
 0x154   : > { %v792_v28 = vpop.eup %791  ;;  %v372_v29 = vmul.f32 %v790_v26, %v992_v32  ;;  %v399_v37 = vadd.f32 %v656_v31, %v385_v30 }
 0x155   : > { %801 = vrsqrt.f32 %v362_v27  ;;  %v375_v24 = vmul.f32 %v792_v28, %v986_v25 }
 0x156   : > { %v386_v34 = vmul.f32 %v655_v23, %v372_v29 }
 0x157   : > { %v794_v35 = vpop.eup %793  ;;  %v389_v40 = vmul.f32 %v655_v23, %v375_v24 }
 0x158   : > { %v796_v36 = vpop.eup %795  ;;  %v400_v38 = vadd.f32 %v656_v31, %v386_v34  ;;  %v376_v39 = vmul.f32 %v794_v35, %v994_v33 }
 0x159   : > { %v373_v41 = vmul.f32 %v796_v36, %v1002_v42  ;;  %v403_v48 = vadd.f32 %v656_v31, %v389_v40 }
 0x15a   : > { %v407_v44 = vpack.c.bf16 %v400_v38, %v399_v37  ;;  %v390_v32 = vmul.f32 %v655_v23, %v376_v39 }
 0x15b   : > { %v798_v45 = vpop.eup %797  ;;  %v387_v49 = vmul.f32 %v655_v23, %v373_v41 }
 0x15c   : > { %v800_v46 = vpop.eup %799  ;;  %v374_v47 = vmul.f32 %v798_v45, %v1004_v43  ;;  %716 = vmatprep.mubr.msk.bf16.mxu0 %vm273_vm0, %v407_v44  ;;  %v404_v25 = vadd.f32 %v656_v31, %v390_v32 }
 0x15d   : > { %v377_v50 = vmul.f32 %v800_v46, %v1012_v52  ;;  %v401_v55 = vadd.f32 %v656_v31, %v387_v49  ;;  %v657_v52 = vld [vmem:[%s1122_s4] ss:$0 sm:$0xff] }
 0x15e   : > { %v409_v51 = vpack.c.bf16 %v404_v25, %v403_v48  ;;  %v388_v54 = vmul.f32 %v655_v23, %v374_v47 }
 0x15f   : > { %v802_v33 = vpop.eup %801  ;;  %v391_v57 = vmul.f32 %v655_v23, %v377_v50 }
 0x160   : > { %v378_v42 = vmul.f32 %v802_v33, %v1014_v53  ;;  %720 = vmatprep.mubr.msk.bf16.mxu1 %vm273_vm0, %v409_v51  ;;  %v402_v56 = vadd.f32 %v656_v31, %v388_v54 }
 0x161   : > { %v405_v59 = vadd.f32 %v656_v31, %v391_v57 }
 0x162   : > { %v408_v43 = vpack.c.bf16 %v402_v56, %v401_v55  ;;  %v392_v58 = vmul.f32 %v655_v23, %v378_v42 }
 0x164   : > { %717 = vmatmul.mubr.msk.bf16.vlgmr.msra.gmra.mrb[0].mxu0 %vm273_vm0, %v408_v43  ;;  %v406_v60 = vadd.f32 %v656_v31, %v392_v58 }
 0x166   : > { %v410_v61 = vpack.c.bf16 %v406_v60, %v405_v59 }
 0x168   : > { %721 = vmatmul.mubr.msk.bf16.vlgmr.msra.gmra.mrb[0].mxu1 %vm273_vm0, %v410_v61 }
 0x237   : > { %v718_v53 = vpop.f32.mrb[0].mxu0 }
 0x238   : > { %v489_v62 = vadd.f32 %v718_v53, %v657_v52  ;;  %v480_v63 = vpop.f32.mrb[1].mxu0 }
 0x239   : > { %v481_v0 = vadd.f32 %v657_v52, %v480_v63  ;;  %v719_v1 = vpop.f32.mrb[2].mxu0 }
 0x23a   : > { %v680_v2 = vpack.c.bf16 %v489_v62, %v489_v62  ;;  %v492_v3 = vadd.f32 %v719_v1, %v657_v52  ;;  %v483_v4 = vpop.f32.mrb[3].mxu0 }
 0x23b   : > { %v678_v5 = vpack.c.bf16 %v481_v0, %v481_v0  ;;  %v484_v6 = vadd.f32 %v657_v52, %v483_v4  ;;  %v722_v7 = vpop.f32.mrb[0].mxu1 }
 0x23c   : > { %546 = vst.msk [vmem:[%s242_s9 + $0x8] sm:$0xf] %vm543_vm1, %v680_v2  ;;  %v681_v8 = vpack.c.bf16 %v492_v3, %v492_v3  ;;  %v505_v9 = vadd.f32 %v722_v7, %v657_v52  ;;  %v496_v10 = vpop.f32.mrb[1].mxu1 }
 0x23d   : > { %544 = vst.msk [vmem:[%s242_s9] sm:$0xf] %vm543_vm1, %v678_v5  ;;  %v679_v11 = vpack.c.bf16 %v484_v6, %v484_v6  ;;  %v497_v12 = vadd.f32 %v657_v52, %v496_v10  ;;  %v723_v13 = vpop.f32.mrb[2].mxu1 }
 0x23e   : > { %547 = vst.msk [vmem:[%s242_s9 + $0xc] sm:$0xf] %vm543_vm1, %v681_v8  ;;  %v684_v14 = vpack.c.bf16 %v505_v9, %v505_v9  ;;  %v508_v15 = vadd.f32 %v723_v13, %v657_v52  ;;  %v499_v16 = vpop.f32.mrb[3].mxu1 }
 0x23f   : > { %545 = vst.msk [vmem:[%s242_s9 + $0x4] sm:$0xf] %vm543_vm1, %v679_v11  ;;  %v682_v17 = vpack.c.bf16 %v497_v12, %v497_v12  ;;  %v500_v18 = vadd.f32 %v657_v52, %v499_v16 }
 0x240   : > { %550 = vst.msk [vmem:[%s242_s9 + $0x18] sm:$0xf] %vm543_vm1, %v684_v14  ;;  %v685_v19 = vpack.c.bf16 %v508_v15, %v508_v15 }
 0x241   : > { %548 = vst.msk [vmem:[%s242_s9 + $0x10] sm:$0xf] %vm543_vm1, %v682_v17  ;;  %v683_v20 = vpack.c.bf16 %v500_v18, %v500_v18 }
 0x242   : > { %551 = vst.msk [vmem:[%s242_s9 + $0x1c] sm:$0xf] %vm543_vm1, %v685_v19 }
 0x243   : > { %549 = vst.msk [vmem:[%s242_s9 + $0x14] sm:$0xf] %vm543_vm1, %v683_v20 }
 0x244   : > { %816 = shalt.err (!%p813_p5)
}
 0x245   : > { %s817_s25 = scalar_lea.hbm %s1063_s14, 512  ;;  %s821_s7 = scalar_lea.hbm %s1123_s5, 1024 }
 0x246   : > { %p818_p6 = scmp.ne.s32.totalorder %s1063_s14, %s817_s25  ;;  %p822_p10 = scmp.lt.u32.totalorder %s1063_s14, %s1123_s5 }
 0x247   : > { %p823_p11 = scmp.lt.u32.totalorder %s821_s7, %s817_s25  ;;  %p825_p13 = scmp.lt.u32.totalorder %s817_s25, %s1063_s14 }
 0x248   : > { %p819_p7 = pnand %p818_p6, %p956_p4 }
 0x249   : > { %p824_p12 = por %p823_p11, %p822_p10 }
 0x24a   : > { %p820_p9 = pneg %p819_p7 }
 0x24b   : > { %p826_p0 = por %p825_p13, %p824_p12 }
 0x24d   : > { %p827_p1 = pnand %p826_p0, %p820_p9 }
 0x24f   : > { %830 = shalt.err (!%p827_p1)
}
 0x250   : > { %s884_s10 = smov 64   ;;  %s885_s12 = smov 4  }
 0x251   : > { %728 = dma.vmem_to_hbm [thread:$0]  (%p956_p4), %s1065_s11, 512, %s1063_s14, %s1072_s21, %s884_s10, %s884_s10, %s885_s12  }
 0x252 PF: > { %p734_p2 = scmp.ge.s32.totalorder %s881_s23, 2  ;;  %s583_s13 = sand.u32 1, %s861_s18  }
 0x253   : > { %s584_s15 = scalar_lea.sflag [#allocation3], %s583_s13 }
 0x254   : > { %p731_p3 = pnand %p734_p2, %p963_p8 }
 0x256   : > { %856 = dma.done.wait (!%p731_p3), %s584_s15, 512  }
 0x257   : > { %858 = vsyncadd (!%p731_p3), %s584_s15, 4294966784  ;;  %s18_s23 = sadd.s32 1, %s881_s23   ;;  %s1126_s18 = smov %s865_s19 }
 0x258   : > { %p15_p5 = scmp.ge.s32.totalorder %s18_s23, 4   ;;  %s1127_s19 = smov %s869_s20 }
 0x259   : > { %s1128_s20 = smov %s969_s6  ;;  %s1129_s21 = smov %s877_s22 }
 0x25a   : > { %s1130_s22 = smov %s1132_s26  ;;  %17 = sbr.rel (!%p15_p5) target bundleno = 4 (0x4), region = 75 }
 0x261   :  { %589 = vsyncpa [#allocation3], 1 }
 0x262   :  { %591 = vsyncpa [#allocation3 + $0x1], 1 }

</bundles_post_ra>
